<compile_context>
chip_gen: v7x
topology: tpu7x:2x2x1
jax: 0.10.0
libtpu: 0.0.40
codegen_flags: <defaults>
</compile_context>

<pallas_src>
import math
import functools

import jax
import jax.numpy as jnp
import numpy as np
from jax.experimental import pallas as pl
from jax.experimental.pallas import tpu as pltpu


# ----------------------------- config ---------------------------------------
class Config:
    head = 4
    k_dim = 8
    d_model = 32
    p_drop = 0.1


# ----------------------------- kernel ---------------------------------------
def _mha_kernel(x_ref, y_ref,
                wq_ref, wk_ref, wv_ref, wo_ref,
                bq_ref, bk_ref, bv_ref, bo_ref,
                out_ref, attn_ref,
                *, head, k_dim, d_model, seq, bc):
    """One grid step processes `bc` batch elements folded along sublanes."""
    S = seq
    x = x_ref[...]                                  # (bc*S, D)
    y = y_ref[...]                                  # (bc*S, D)
    inv_sqrt = 1.0 / math.sqrt(k_dim)

    # Per-head projections from pre-split weight stacks.  wX_ref[h] is a full
    # (D, head_dim) block, so there is no in-kernel lane slicing at all.
    q_h = [jnp.dot(x, wq_ref[h], preferred_element_type=jnp.float32) + bq_ref[h]
           for h in range(head)]                    # each (bc*S, k_dim)
    k_h = [jnp.dot(y, wk_ref[h], preferred_element_type=jnp.float32) + bk_ref[h]
           for h in range(head)]                    # each (bc*S, k_dim)
    v_h = [jnp.dot(y, wv_ref[h], preferred_element_type=jnp.float32) + bv_ref[h]
           for h in range(head)]                    # each (bc*S, dv)

    # Stack every (batch, head) score block along sublanes -> ONE softmax.
    blocks = []
    for b in range(bc):                             # static loops (tiny)
        r0, r1 = b * S, (b + 1) * S                 # sublane slice, 8-aligned
        for h in range(head):
            s = jnp.dot(q_h[h][r0:r1, :], k_h[h][r0:r1, :].T,
                        preferred_element_type=jnp.float32) * inv_sqrt
            blocks.append(s)                        # (S, S)
    slab = blocks[0] if len(blocks) == 1 else jnp.concatenate(blocks, axis=0)

    m = jnp.max(slab, axis=-1, keepdims=True)
    p = jnp.exp(slab - m)
    denom = jnp.sum(p, axis=-1, keepdims=True)
    # pl.reciprocal(..., approx=True) would push this to the EUP slot, but the
    # exact form keeps the 1e-5 tolerance vs. the reference.
    attn = p * pl.reciprocal(denom, approx=False)   # (bc*head*S, S)

    # Single whole-block store; reshape only splits leading (sublane-tile
    # aligned) dims, so it is layout preserving.
    attn_ref[...] = attn.reshape(bc, head, S, S).astype(attn_ref.dtype)

    # Per-head MXU-accumulated output projection (no lane concatenation).
    bo = bo_ref[...]                                # (1, D)
    out_rows = []
    for b in range(bc):
        r0, r1 = b * S, (b + 1) * S
        acc = None
        for h in range(head):
            a = attn[(b * head + h) * S:(b * head + h + 1) * S, :]    # (S, S)
            ctx = jnp.dot(a, v_h[h][r0:r1, :],
                          preferred_element_type=jnp.float32)         # (S, dv)
            contrib = jnp.dot(ctx, wo_ref[h],
                              preferred_element_type=jnp.float32)     # (S, D)
            acc = contrib if acc is None else acc + contrib
        out_rows.append(acc + bo)
    out2d = out_rows[0] if bc == 1 else jnp.concatenate(out_rows, axis=0)
    out_ref[...] = out2d.reshape(bc, S, d_model).astype(out_ref.dtype)


# ----------------------------- wrapper ---------------------------------------
def multi_head_attention(x, y, params, *, head, k_dim, d_model):
    """x, y: (B, S, d_model) float32. params: dict of PyTorch-layout weights."""
    B, S, D = x.shape
    assert D == d_model and y.shape == x.shape
    assert d_model % head == 0
    dv = d_model // head

    # Batch chunking: 2-wide "parallel" grid when possible (keeps both v7x
    # TensorCores busy) while folding the rest of the batch into sublanes
    # (fewer fixed-overhead grid steps on v5e/v6e).
    if B % 2 == 0 and ((B // 2) * S) % 8 == 0:
        num_chunks = 2
    else:
        num_chunks = 1
    bc = B // num_chunks

    # PyTorch nn.Linear weight is (out, in); pre-split per head in the wrapper
    # so the kernel does plain row-major matmuls with no head slicing.
    wq_h = params["wq"].reshape(head, k_dim, D).transpose(0, 2, 1)   # (H, D, k_dim)
    wk_h = params["wk"].reshape(head, k_dim, D).transpose(0, 2, 1)   # (H, D, k_dim)
    wv_h = params["wv"].reshape(head, dv, D).transpose(0, 2, 1)      # (H, D, dv)
    wo_h = params["wo"].T.reshape(head, dv, D)                       # (H, dv, D)
    bq_h = params["bq"].reshape(head, 1, k_dim)
    bk_h = params["bk"].reshape(head, 1, k_dim)
    bv_h = params["bv"].reshape(head, 1, dv)
    bo2 = params["bo"].reshape(1, D)

    # Fold batch into the sublane axis.
    x2d = x.reshape(B * S, D)
    y2d = y.reshape(B * S, D)

    kernel = functools.partial(_mha_kernel, head=head, k_dim=k_dim,
                               d_model=d_model, seq=S, bc=bc)

    def const(arr):
        nd = arr.ndim
        return pl.BlockSpec(arr.shape, lambda g: (0,) * nd)

    out, attn = pl.pallas_call(
        kernel,
        out_shape=(
            jax.ShapeDtypeStruct((B, S, D), jnp.float32),
            jax.ShapeDtypeStruct((B, head, S, S), jnp.float32),
        ),
        grid_spec=pltpu.PrefetchScalarGridSpec(
            num_scalar_prefetch=0,
            grid=(num_chunks,),
            in_specs=[
                pl.BlockSpec((bc * S, D), lambda g: (g, 0)),   # x chunk
                pl.BlockSpec((bc * S, D), lambda g: (g, 0)),   # y chunk
                const(wq_h), const(wk_h), const(wv_h), const(wo_h),
                const(bq_h), const(bk_h), const(bv_h), const(bo2),
            ],
            out_specs=[
                pl.BlockSpec((bc, S, D), lambda g: (g, 0, 0)),
                pl.BlockSpec((bc, head, S, S), lambda g: (g, 0, 0, 0)),
            ],
        ),
        compiler_params=pltpu.CompilerParams(
            dimension_semantics=("parallel",)),
    )(x2d, y2d, wq_h, wk_h, wv_h, wo_h, bq_h, bk_h, bv_h, bo2)
    return out, attn


# ----------------------------- reference (pure JAX) ---------------------------
def mha_reference(x, y, params, *, head, k_dim, d_model):
    B, S, D = x.shape
    q = x @ params["wq"].T + params["bq"]
    k = y @ params["wk"].T + params["bk"]
    v = y @ params["wv"].T + params["bv"]
    q = q.reshape(B, S, head, k_dim).transpose(0, 2, 1, 3)       # (B,H,S,kd)
    kT = k.reshape(B, S, head, k_dim).transpose(0, 2, 3, 1)      # (B,H,kd,S)
    v = v.reshape(B, S, head, D // head).transpose(0, 2, 1, 3)   # (B,H,S,dv)
    s = jnp.matmul(q, kT) / math.sqrt(k_dim)
    attn = jax.nn.softmax(s, axis=3)
    ctx = jnp.matmul(attn, v).transpose(0, 2, 1, 3).reshape(B, S, D)
    out = ctx @ params["wo"].T + params["bo"]
    return out, attn


# ----------------------------- main ------------------------------------------
if __name__ == "__main__":
    cfg = Config()
    B, S = 2, 8
    D, H, KD = cfg.d_model, cfg.head, cfg.k_dim

    key = jax.random.PRNGKey(0)
    keys = jax.random.split(key, 12)

    def linear_init(kw, kb, out_dim, in_dim):
        bound = 1.0 / math.sqrt(in_dim)
        w = jax.random.uniform(kw, (out_dim, in_dim), jnp.float32, -bound, bound)
        b = jax.random.uniform(kb, (out_dim,), jnp.float32, -bound, bound)
        return w, b

    wq, bq = linear_init(keys[0], keys[1], H * KD, D)
    wk, bk = linear_init(keys[2], keys[3], H * KD, D)
    wv, bv = linear_init(keys[4], keys[5], D, D)
    wo, bo = linear_init(keys[6], keys[7], D, D)
    params = dict(wq=wq, bq=bq, wk=wk, bk=bk, wv=wv, bv=bv, wo=wo, bo=bo)

    x = jax.random.normal(keys[8], (B, S, D), jnp.float32)
    y = jax.random.normal(keys[9], (B, S, D), jnp.float32)

    out, attn = multi_head_attention(x, y, params, head=H, k_dim=KD, d_model=D)
    out, attn = jax.block_until_ready(out), jax.block_until_ready(attn)

    ref_out, ref_attn = mha_reference(x, y, params, head=H, k_dim=KD, d_model=D)
    np.testing.assert_allclose(np.asarray(out), np.asarray(ref_out), rtol=1e-5, atol=1e-5)
    np.testing.assert_allclose(np.asarray(attn), np.asarray(ref_attn), rtol=1e-5, atol=1e-5)

    print("KERNEL_OK")
</pallas_src>

<mosaic_0001>
module attributes {stable_mosaic.version = 11 : i64} {
  func.func @_mha_kernel(%arg0: i32, %arg1: memref<8x32xf32, #tpu.memory_space<vmem>>, %arg2: memref<8x32xf32, #tpu.memory_space<vmem>>, %arg3: memref<4x32x8xf32, #tpu.memory_space<vmem>>, %arg4: memref<4x32x8xf32, #tpu.memory_space<vmem>>, %arg5: memref<4x32x8xf32, #tpu.memory_space<vmem>>, %arg6: memref<4x8x32xf32, #tpu.memory_space<vmem>>, %arg7: memref<4x1x8xf32, #tpu.memory_space<vmem>>, %arg8: memref<4x1x8xf32, #tpu.memory_space<vmem>>, %arg9: memref<4x1x8xf32, #tpu.memory_space<vmem>>, %arg10: memref<1x32xf32, #tpu.memory_space<vmem>>, %arg11: memref<1x8x32xf32, #tpu.memory_space<vmem>>, %arg12: memref<1x4x8x8xf32, #tpu.memory_space<vmem>>) attributes {dimension_semantics = [#tpu.dimension_semantics<parallel>], iteration_bounds = array<i64: 2>, scalar_prefetch = 0 : i64, scratch_operands = 0 : i64, tpu.core_type = #tpu.core_type<tc>, window_params = [{transform_indices = @transform_0, window_bounds = array<i64: 8, 32>}, {transform_indices = @transform_1, window_bounds = array<i64: 8, 32>}, {pipeline_mode = #tpu.pipeline_mode<synchronous>, transform_indices = @transform_2, window_bounds = array<i64: 4, 32, 8>}, {pipeline_mode = #tpu.pipeline_mode<synchronous>, transform_indices = @transform_3, window_bounds = array<i64: 4, 32, 8>}, {pipeline_mode = #tpu.pipeline_mode<synchronous>, transform_indices = @transform_4, window_bounds = array<i64: 4, 32, 8>}, {pipeline_mode = #tpu.pipeline_mode<synchronous>, transform_indices = @transform_5, window_bounds = array<i64: 4, 8, 32>}, {pipeline_mode = #tpu.pipeline_mode<synchronous>, transform_indices = @transform_6, window_bounds = array<i64: 4, 1, 8>}, {pipeline_mode = #tpu.pipeline_mode<synchronous>, transform_indices = @transform_7, window_bounds = array<i64: 4, 1, 8>}, {pipeline_mode = #tpu.pipeline_mode<synchronous>, transform_indices = @transform_8, window_bounds = array<i64: 4, 1, 8>}, {pipeline_mode = #tpu.pipeline_mode<synchronous>, transform_indices = @transform_9, window_bounds = array<i64: 1, 32>}, {transform_indices = @transform_10, window_bounds = array<i64: 1, 8, 32>}, {transform_indices = @transform_11, window_bounds = array<i64: 1, 4, 8, 8>}]} {
    %c0 = arith.constant 0 : index
    %c0_0 = arith.constant 0 : index
    %0 = vector.load %arg1[%c0, %c0_0] : memref<8x32xf32, #tpu.memory_space<vmem>>, vector<8x32xf32>
    %c0_1 = arith.constant 0 : index
    %c0_2 = arith.constant 0 : index
    %1 = vector.load %arg2[%c0_1, %c0_2] : memref<8x32xf32, #tpu.memory_space<vmem>>, vector<8x32xf32>
    %c0_3 = arith.constant 0 : index
    %c0_4 = arith.constant 0 : index
    %c0_5 = arith.constant 0 : index
    %2 = vector.load %arg3[%c0_3, %c0_4, %c0_5] : memref<4x32x8xf32, #tpu.memory_space<vmem>>, vector<1x32x8xf32>
    %3 = vector.shape_cast %2 : vector<1x32x8xf32> to vector<32x8xf32>
    %cst = arith.constant dense<0.000000e+00> : vector<8x8xf32>
    %4 = tpu.matmul %0, %3, %cst {dimension_numbers = #tpu.dot_dimension_numbers<[1], [0], [0], [1], [0, 0, 1, 1], [], []>} : vector<8x32xf32>, vector<32x8xf32>, vector<8x8xf32> -> vector<8x8xf32>
    %c0_6 = arith.constant 0 : index
    %c0_7 = arith.constant 0 : index
    %c0_8 = arith.constant 0 : index
    %5 = vector.load %arg7[%c0_6, %c0_7, %c0_8] : memref<4x1x8xf32, #tpu.memory_space<vmem>>, vector<1x1x8xf32>
    %6 = vector.shape_cast %5 : vector<1x1x8xf32> to vector<1x8xf32>
    %7 = vector.broadcast %6 : vector<1x8xf32> to vector<8x8xf32>
    %8 = arith.addf %4, %7 : vector<8x8xf32>
    %c1 = arith.constant 1 : index
    %c0_9 = arith.constant 0 : index
    %c0_10 = arith.constant 0 : index
    %9 = vector.load %arg3[%c1, %c0_9, %c0_10] : memref<4x32x8xf32, #tpu.memory_space<vmem>>, vector<1x32x8xf32>
    %10 = vector.shape_cast %9 : vector<1x32x8xf32> to vector<32x8xf32>
    %cst_11 = arith.constant dense<0.000000e+00> : vector<8x8xf32>
    %11 = tpu.matmul %0, %10, %cst_11 {dimension_numbers = #tpu.dot_dimension_numbers<[1], [0], [0], [1], [0, 0, 1, 1], [], []>} : vector<8x32xf32>, vector<32x8xf32>, vector<8x8xf32> -> vector<8x8xf32>
    %c1_12 = arith.constant 1 : index
    %c0_13 = arith.constant 0 : index
    %c0_14 = arith.constant 0 : index
    %12 = vector.load %arg7[%c1_12, %c0_13, %c0_14] : memref<4x1x8xf32, #tpu.memory_space<vmem>>, vector<1x1x8xf32>
    %13 = vector.shape_cast %12 : vector<1x1x8xf32> to vector<1x8xf32>
    %14 = vector.broadcast %13 : vector<1x8xf32> to vector<8x8xf32>
    %15 = arith.addf %11, %14 : vector<8x8xf32>
    %c2 = arith.constant 2 : index
    %c0_15 = arith.constant 0 : index
    %c0_16 = arith.constant 0 : index
    %16 = vector.load %arg3[%c2, %c0_15, %c0_16] : memref<4x32x8xf32, #tpu.memory_space<vmem>>, vector<1x32x8xf32>
    %17 = vector.shape_cast %16 : vector<1x32x8xf32> to vector<32x8xf32>
    %cst_17 = arith.constant dense<0.000000e+00> : vector<8x8xf32>
    %18 = tpu.matmul %0, %17, %cst_17 {dimension_numbers = #tpu.dot_dimension_numbers<[1], [0], [0], [1], [0, 0, 1, 1], [], []>} : vector<8x32xf32>, vector<32x8xf32>, vector<8x8xf32> -> vector<8x8xf32>
    %c2_18 = arith.constant 2 : index
    %c0_19 = arith.constant 0 : index
    %c0_20 = arith.constant 0 : index
    %19 = vector.load %arg7[%c2_18, %c0_19, %c0_20] : memref<4x1x8xf32, #tpu.memory_space<vmem>>, vector<1x1x8xf32>
    %20 = vector.shape_cast %19 : vector<1x1x8xf32> to vector<1x8xf32>
    %21 = vector.broadcast %20 : vector<1x8xf32> to vector<8x8xf32>
    %22 = arith.addf %18, %21 : vector<8x8xf32>
    %c3 = arith.constant 3 : index
    %c0_21 = arith.constant 0 : index
    %c0_22 = arith.constant 0 : index
    %23 = vector.load %arg3[%c3, %c0_21, %c0_22] : memref<4x32x8xf32, #tpu.memory_space<vmem>>, vector<1x32x8xf32>
    %24 = vector.shape_cast %23 : vector<1x32x8xf32> to vector<32x8xf32>
    %cst_23 = arith.constant dense<0.000000e+00> : vector<8x8xf32>
    %25 = tpu.matmul %0, %24, %cst_23 {dimension_numbers = #tpu.dot_dimension_numbers<[1], [0], [0], [1], [0, 0, 1, 1], [], []>} : vector<8x32xf32>, vector<32x8xf32>, vector<8x8xf32> -> vector<8x8xf32>
    %c3_24 = arith.constant 3 : index
    %c0_25 = arith.constant 0 : index
    %c0_26 = arith.constant 0 : index
    %26 = vector.load %arg7[%c3_24, %c0_25, %c0_26] : memref<4x1x8xf32, #tpu.memory_space<vmem>>, vector<1x1x8xf32>
    %27 = vector.shape_cast %26 : vector<1x1x8xf32> to vector<1x8xf32>
    %28 = vector.broadcast %27 : vector<1x8xf32> to vector<8x8xf32>
    %29 = arith.addf %25, %28 : vector<8x8xf32>
    %c0_27 = arith.constant 0 : index
    %c0_28 = arith.constant 0 : index
    %c0_29 = arith.constant 0 : index
    %30 = vector.load %arg4[%c0_27, %c0_28, %c0_29] : memref<4x32x8xf32, #tpu.memory_space<vmem>>, vector<1x32x8xf32>
    %31 = vector.shape_cast %30 : vector<1x32x8xf32> to vector<32x8xf32>
    %cst_30 = arith.constant dense<0.000000e+00> : vector<8x8xf32>
    %32 = tpu.matmul %1, %31, %cst_30 {dimension_numbers = #tpu.dot_dimension_numbers<[1], [0], [0], [1], [0, 0, 1, 1], [], []>} : vector<8x32xf32>, vector<32x8xf32>, vector<8x8xf32> -> vector<8x8xf32>
    %c0_31 = arith.constant 0 : index
    %c0_32 = arith.constant 0 : index
    %c0_33 = arith.constant 0 : index
    %33 = vector.load %arg8[%c0_31, %c0_32, %c0_33] : memref<4x1x8xf32, #tpu.memory_space<vmem>>, vector<1x1x8xf32>
    %34 = vector.shape_cast %33 : vector<1x1x8xf32> to vector<1x8xf32>
    %35 = vector.broadcast %34 : vector<1x8xf32> to vector<8x8xf32>
    %36 = arith.addf %32, %35 : vector<8x8xf32>
    %c1_34 = arith.constant 1 : index
    %c0_35 = arith.constant 0 : index
    %c0_36 = arith.constant 0 : index
    %37 = vector.load %arg4[%c1_34, %c0_35, %c0_36] : memref<4x32x8xf32, #tpu.memory_space<vmem>>, vector<1x32x8xf32>
    %38 = vector.shape_cast %37 : vector<1x32x8xf32> to vector<32x8xf32>
    %cst_37 = arith.constant dense<0.000000e+00> : vector<8x8xf32>
    %39 = tpu.matmul %1, %38, %cst_37 {dimension_numbers = #tpu.dot_dimension_numbers<[1], [0], [0], [1], [0, 0, 1, 1], [], []>} : vector<8x32xf32>, vector<32x8xf32>, vector<8x8xf32> -> vector<8x8xf32>
    %c1_38 = arith.constant 1 : index
    %c0_39 = arith.constant 0 : index
    %c0_40 = arith.constant 0 : index
    %40 = vector.load %arg8[%c1_38, %c0_39, %c0_40] : memref<4x1x8xf32, #tpu.memory_space<vmem>>, vector<1x1x8xf32>
    %41 = vector.shape_cast %40 : vector<1x1x8xf32> to vector<1x8xf32>
    %42 = vector.broadcast %41 : vector<1x8xf32> to vector<8x8xf32>
    %43 = arith.addf %39, %42 : vector<8x8xf32>
    %c2_41 = arith.constant 2 : index
    %c0_42 = arith.constant 0 : index
    %c0_43 = arith.constant 0 : index
    %44 = vector.load %arg4[%c2_41, %c0_42, %c0_43] : memref<4x32x8xf32, #tpu.memory_space<vmem>>, vector<1x32x8xf32>
    %45 = vector.shape_cast %44 : vector<1x32x8xf32> to vector<32x8xf32>
    %cst_44 = arith.constant dense<0.000000e+00> : vector<8x8xf32>
    %46 = tpu.matmul %1, %45, %cst_44 {dimension_numbers = #tpu.dot_dimension_numbers<[1], [0], [0], [1], [0, 0, 1, 1], [], []>} : vector<8x32xf32>, vector<32x8xf32>, vector<8x8xf32> -> vector<8x8xf32>
    %c2_45 = arith.constant 2 : index
    %c0_46 = arith.constant 0 : index
    %c0_47 = arith.constant 0 : index
    %47 = vector.load %arg8[%c2_45, %c0_46, %c0_47] : memref<4x1x8xf32, #tpu.memory_space<vmem>>, vector<1x1x8xf32>
    %48 = vector.shape_cast %47 : vector<1x1x8xf32> to vector<1x8xf32>
    %49 = vector.broadcast %48 : vector<1x8xf32> to vector<8x8xf32>
    %50 = arith.addf %46, %49 : vector<8x8xf32>
    %c3_48 = arith.constant 3 : index
    %c0_49 = arith.constant 0 : index
    %c0_50 = arith.constant 0 : index
    %51 = vector.load %arg4[%c3_48, %c0_49, %c0_50] : memref<4x32x8xf32, #tpu.memory_space<vmem>>, vector<1x32x8xf32>
    %52 = vector.shape_cast %51 : vector<1x32x8xf32> to vector<32x8xf32>
    %cst_51 = arith.constant dense<0.000000e+00> : vector<8x8xf32>
    %53 = tpu.matmul %1, %52, %cst_51 {dimension_numbers = #tpu.dot_dimension_numbers<[1], [0], [0], [1], [0, 0, 1, 1], [], []>} : vector<8x32xf32>, vector<32x8xf32>, vector<8x8xf32> -> vector<8x8xf32>
    %c3_52 = arith.constant 3 : index
    %c0_53 = arith.constant 0 : index
    %c0_54 = arith.constant 0 : index
    %54 = vector.load %arg8[%c3_52, %c0_53, %c0_54] : memref<4x1x8xf32, #tpu.memory_space<vmem>>, vector<1x1x8xf32>
    %55 = vector.shape_cast %54 : vector<1x1x8xf32> to vector<1x8xf32>
    %56 = vector.broadcast %55 : vector<1x8xf32> to vector<8x8xf32>
    %57 = arith.addf %53, %56 : vector<8x8xf32>
    %c0_55 = arith.constant 0 : index
    %c0_56 = arith.constant 0 : index
    %c0_57 = arith.constant 0 : index
    %58 = vector.load %arg5[%c0_55, %c0_56, %c0_57] : memref<4x32x8xf32, #tpu.memory_space<vmem>>, vector<1x32x8xf32>
    %59 = vector.shape_cast %58 : vector<1x32x8xf32> to vector<32x8xf32>
    %cst_58 = arith.constant dense<0.000000e+00> : vector<8x8xf32>
    %60 = tpu.matmul %1, %59, %cst_58 {dimension_numbers = #tpu.dot_dimension_numbers<[1], [0], [0], [1], [0, 0, 1, 1], [], []>} : vector<8x32xf32>, vector<32x8xf32>, vector<8x8xf32> -> vector<8x8xf32>
    %c0_59 = arith.constant 0 : index
    %c0_60 = arith.constant 0 : index
    %c0_61 = arith.constant 0 : index
    %61 = vector.load %arg9[%c0_59, %c0_60, %c0_61] : memref<4x1x8xf32, #tpu.memory_space<vmem>>, vector<1x1x8xf32>
    %62 = vector.shape_cast %61 : vector<1x1x8xf32> to vector<1x8xf32>
    %63 = vector.broadcast %62 : vector<1x8xf32> to vector<8x8xf32>
    %64 = arith.addf %60, %63 : vector<8x8xf32>
    %c1_62 = arith.constant 1 : index
    %c0_63 = arith.constant 0 : index
    %c0_64 = arith.constant 0 : index
    %65 = vector.load %arg5[%c1_62, %c0_63, %c0_64] : memref<4x32x8xf32, #tpu.memory_space<vmem>>, vector<1x32x8xf32>
    %66 = vector.shape_cast %65 : vector<1x32x8xf32> to vector<32x8xf32>
    %cst_65 = arith.constant dense<0.000000e+00> : vector<8x8xf32>
    %67 = tpu.matmul %1, %66, %cst_65 {dimension_numbers = #tpu.dot_dimension_numbers<[1], [0], [0], [1], [0, 0, 1, 1], [], []>} : vector<8x32xf32>, vector<32x8xf32>, vector<8x8xf32> -> vector<8x8xf32>
    %c1_66 = arith.constant 1 : index
    %c0_67 = arith.constant 0 : index
    %c0_68 = arith.constant 0 : index
    %68 = vector.load %arg9[%c1_66, %c0_67, %c0_68] : memref<4x1x8xf32, #tpu.memory_space<vmem>>, vector<1x1x8xf32>
    %69 = vector.shape_cast %68 : vector<1x1x8xf32> to vector<1x8xf32>
    %70 = vector.broadcast %69 : vector<1x8xf32> to vector<8x8xf32>
    %71 = arith.addf %67, %70 : vector<8x8xf32>
    %c2_69 = arith.constant 2 : index
    %c0_70 = arith.constant 0 : index
    %c0_71 = arith.constant 0 : index
    %72 = vector.load %arg5[%c2_69, %c0_70, %c0_71] : memref<4x32x8xf32, #tpu.memory_space<vmem>>, vector<1x32x8xf32>
    %73 = vector.shape_cast %72 : vector<1x32x8xf32> to vector<32x8xf32>
    %cst_72 = arith.constant dense<0.000000e+00> : vector<8x8xf32>
    %74 = tpu.matmul %1, %73, %cst_72 {dimension_numbers = #tpu.dot_dimension_numbers<[1], [0], [0], [1], [0, 0, 1, 1], [], []>} : vector<8x32xf32>, vector<32x8xf32>, vector<8x8xf32> -> vector<8x8xf32>
    %c2_73 = arith.constant 2 : index
    %c0_74 = arith.constant 0 : index
    %c0_75 = arith.constant 0 : index
    %75 = vector.load %arg9[%c2_73, %c0_74, %c0_75] : memref<4x1x8xf32, #tpu.memory_space<vmem>>, vector<1x1x8xf32>
    %76 = vector.shape_cast %75 : vector<1x1x8xf32> to vector<1x8xf32>
    %77 = vector.broadcast %76 : vector<1x8xf32> to vector<8x8xf32>
    %78 = arith.addf %74, %77 : vector<8x8xf32>
    %c3_76 = arith.constant 3 : index
    %c0_77 = arith.constant 0 : index
    %c0_78 = arith.constant 0 : index
    %79 = vector.load %arg5[%c3_76, %c0_77, %c0_78] : memref<4x32x8xf32, #tpu.memory_space<vmem>>, vector<1x32x8xf32>
    %80 = vector.shape_cast %79 : vector<1x32x8xf32> to vector<32x8xf32>
    %cst_79 = arith.constant dense<0.000000e+00> : vector<8x8xf32>
    %81 = tpu.matmul %1, %80, %cst_79 {dimension_numbers = #tpu.dot_dimension_numbers<[1], [0], [0], [1], [0, 0, 1, 1], [], []>} : vector<8x32xf32>, vector<32x8xf32>, vector<8x8xf32> -> vector<8x8xf32>
    %c3_80 = arith.constant 3 : index
    %c0_81 = arith.constant 0 : index
    %c0_82 = arith.constant 0 : index
    %82 = vector.load %arg9[%c3_80, %c0_81, %c0_82] : memref<4x1x8xf32, #tpu.memory_space<vmem>>, vector<1x1x8xf32>
    %83 = vector.shape_cast %82 : vector<1x1x8xf32> to vector<1x8xf32>
    %84 = vector.broadcast %83 : vector<1x8xf32> to vector<8x8xf32>
    %85 = arith.addf %81, %84 : vector<8x8xf32>
    %86 = tpu.transpose %36, [1, 0] : vector<8x8xf32> -> vector<8x8xf32>
    %cst_83 = arith.constant dense<0.000000e+00> : vector<8x8xf32>
    %87 = tpu.matmul %8, %86, %cst_83 {dimension_numbers = #tpu.dot_dimension_numbers<[1], [0], [0], [1], [0, 0, 1, 1], [], []>} : vector<8x8xf32>, vector<8x8xf32>, vector<8x8xf32> -> vector<8x8xf32>
    %cst_84 = arith.constant 0.353553385 : f32
    %88 = vector.broadcast %cst_84 : f32 to vector<8x8xf32>
    %89 = arith.mulf %87, %88 : vector<8x8xf32>
    %90 = tpu.transpose %43, [1, 0] : vector<8x8xf32> -> vector<8x8xf32>
    %cst_85 = arith.constant dense<0.000000e+00> : vector<8x8xf32>
    %91 = tpu.matmul %15, %90, %cst_85 {dimension_numbers = #tpu.dot_dimension_numbers<[1], [0], [0], [1], [0, 0, 1, 1], [], []>} : vector<8x8xf32>, vector<8x8xf32>, vector<8x8xf32> -> vector<8x8xf32>
    %cst_86 = arith.constant 0.353553385 : f32
    %92 = vector.broadcast %cst_86 : f32 to vector<8x8xf32>
    %93 = arith.mulf %91, %92 : vector<8x8xf32>
    %94 = tpu.transpose %50, [1, 0] : vector<8x8xf32> -> vector<8x8xf32>
    %cst_87 = arith.constant dense<0.000000e+00> : vector<8x8xf32>
    %95 = tpu.matmul %22, %94, %cst_87 {dimension_numbers = #tpu.dot_dimension_numbers<[1], [0], [0], [1], [0, 0, 1, 1], [], []>} : vector<8x8xf32>, vector<8x8xf32>, vector<8x8xf32> -> vector<8x8xf32>
    %cst_88 = arith.constant 0.353553385 : f32
    %96 = vector.broadcast %cst_88 : f32 to vector<8x8xf32>
    %97 = arith.mulf %95, %96 : vector<8x8xf32>
    %98 = tpu.transpose %57, [1, 0] : vector<8x8xf32> -> vector<8x8xf32>
    %cst_89 = arith.constant dense<0.000000e+00> : vector<8x8xf32>
    %99 = tpu.matmul %29, %98, %cst_89 {dimension_numbers = #tpu.dot_dimension_numbers<[1], [0], [0], [1], [0, 0, 1, 1], [], []>} : vector<8x8xf32>, vector<8x8xf32>, vector<8x8xf32> -> vector<8x8xf32>
    %cst_90 = arith.constant 0.353553385 : f32
    %100 = vector.broadcast %cst_90 : f32 to vector<8x8xf32>
    %101 = arith.mulf %99, %100 : vector<8x8xf32>
    %102 = tpu.concatenate %89, %93, %97, %101 in 0 : vector<8x8xf32>, vector<8x8xf32>, vector<8x8xf32>, vector<8x8xf32> -> vector<32x8xf32>
    %cst_91 = arith.constant dense<0xFF800000> : vector<32xf32>
    %103 = vector.multi_reduction <maximumf>, %102, %cst_91 [1] : vector<32x8xf32> to vector<32xf32>
    %104 = vector.shape_cast %103 : vector<32xf32> to vector<32x1xf32>
    %105 = vector.broadcast %104 : vector<32x1xf32> to vector<32x8xf32>
    %106 = arith.subf %102, %105 : vector<32x8xf32>
    %107 = math.exp %106 : vector<32x8xf32>
    %cst_92 = arith.constant dense<0.000000e+00> : vector<32xf32>
    %108 = vector.multi_reduction <add>, %107, %cst_92 [1] : vector<32x8xf32> to vector<32xf32>
    %109 = vector.shape_cast %108 : vector<32xf32> to vector<32x1xf32>
    %110 = tpu.reciprocal %109 : vector<32x1xf32> -> vector<32x1xf32>
    %111 = vector.broadcast %110 : vector<32x1xf32> to vector<32x8xf32>
    %112 = arith.mulf %107, %111 : vector<32x8xf32>
    %113 = vector.shape_cast %112 : vector<32x8xf32> to vector<1x4x8x8xf32>
    %c0_93 = arith.constant 0 : index
    %c0_94 = arith.constant 0 : index
    %c0_95 = arith.constant 0 : index
    %c0_96 = arith.constant 0 : index
    %114 = vector.load %arg12[%c0_93, %c0_94, %c0_95, %c0_96] : memref<1x4x8x8xf32, #tpu.memory_space<vmem>>, vector<1x4x8x8xf32>
    tpu.vector_store %arg12[%c0_93, %c0_94, %c0_95, %c0_96], %113 {strides = array<i32>} : memref<1x4x8x8xf32, #tpu.memory_space<vmem>>, vector<1x4x8x8xf32>,
    %c0_97 = arith.constant 0 : index
    %c0_98 = arith.constant 0 : index
    %115 = vector.load %arg10[%c0_97, %c0_98] : memref<1x32xf32, #tpu.memory_space<vmem>>, vector<1x32xf32>
    %116 = vector.extract_strided_slice %112 {offsets = [0, 0], sizes = [8, 8], strides = [1, 1]} : vector<32x8xf32> to vector<8x8xf32>
    %cst_99 = arith.constant dense<0.000000e+00> : vector<8x8xf32>
    %117 = tpu.matmul %116, %64, %cst_99 {dimension_numbers = #tpu.dot_dimension_numbers<[1], [0], [0], [1], [0, 0, 1, 1], [], []>} : vector<8x8xf32>, vector<8x8xf32>, vector<8x8xf32> -> vector<8x8xf32>
    %c0_100 = arith.constant 0 : index
    %c0_101 = arith.constant 0 : index
    %c0_102 = arith.constant 0 : index
    %118 = vector.load %arg6[%c0_100, %c0_101, %c0_102] : memref<4x8x32xf32, #tpu.memory_space<vmem>>, vector<1x8x32xf32>
    %119 = vector.shape_cast %118 : vector<1x8x32xf32> to vector<8x32xf32>
    %cst_103 = arith.constant dense<0.000000e+00> : vector<8x32xf32>
    %120 = tpu.matmul %117, %119, %cst_103 {dimension_numbers = #tpu.dot_dimension_numbers<[1], [0], [0], [1], [0, 0, 1, 1], [], []>} : vector<8x8xf32>, vector<8x32xf32>, vector<8x32xf32> -> vector<8x32xf32>
    %121 = vector.extract_strided_slice %112 {offsets = [8, 0], sizes = [8, 8], strides = [1, 1]} : vector<32x8xf32> to vector<8x8xf32>
    %cst_104 = arith.constant dense<0.000000e+00> : vector<8x8xf32>
    %122 = tpu.matmul %121, %71, %cst_104 {dimension_numbers = #tpu.dot_dimension_numbers<[1], [0], [0], [1], [0, 0, 1, 1], [], []>} : vector<8x8xf32>, vector<8x8xf32>, vector<8x8xf32> -> vector<8x8xf32>
    %c1_105 = arith.constant 1 : index
    %c0_106 = arith.constant 0 : index
    %c0_107 = arith.constant 0 : index
    %123 = vector.load %arg6[%c1_105, %c0_106, %c0_107] : memref<4x8x32xf32, #tpu.memory_space<vmem>>, vector<1x8x32xf32>
    %124 = vector.shape_cast %123 : vector<1x8x32xf32> to vector<8x32xf32>
    %cst_108 = arith.constant dense<0.000000e+00> : vector<8x32xf32>
    %125 = tpu.matmul %122, %124, %cst_108 {dimension_numbers = #tpu.dot_dimension_numbers<[1], [0], [0], [1], [0, 0, 1, 1], [], []>} : vector<8x8xf32>, vector<8x32xf32>, vector<8x32xf32> -> vector<8x32xf32>
    %126 = arith.addf %120, %125 : vector<8x32xf32>
    %127 = vector.extract_strided_slice %112 {offsets = [16, 0], sizes = [8, 8], strides = [1, 1]} : vector<32x8xf32> to vector<8x8xf32>
    %cst_109 = arith.constant dense<0.000000e+00> : vector<8x8xf32>
    %128 = tpu.matmul %127, %78, %cst_109 {dimension_numbers = #tpu.dot_dimension_numbers<[1], [0], [0], [1], [0, 0, 1, 1], [], []>} : vector<8x8xf32>, vector<8x8xf32>, vector<8x8xf32> -> vector<8x8xf32>
    %c2_110 = arith.constant 2 : index
    %c0_111 = arith.constant 0 : index
    %c0_112 = arith.constant 0 : index
    %129 = vector.load %arg6[%c2_110, %c0_111, %c0_112] : memref<4x8x32xf32, #tpu.memory_space<vmem>>, vector<1x8x32xf32>
    %130 = vector.shape_cast %129 : vector<1x8x32xf32> to vector<8x32xf32>
    %cst_113 = arith.constant dense<0.000000e+00> : vector<8x32xf32>
    %131 = tpu.matmul %128, %130, %cst_113 {dimension_numbers = #tpu.dot_dimension_numbers<[1], [0], [0], [1], [0, 0, 1, 1], [], []>} : vector<8x8xf32>, vector<8x32xf32>, vector<8x32xf32> -> vector<8x32xf32>
    %132 = arith.addf %126, %131 : vector<8x32xf32>
    %133 = vector.extract_strided_slice %112 {offsets = [24, 0], sizes = [8, 8], strides = [1, 1]} : vector<32x8xf32> to vector<8x8xf32>
    %cst_114 = arith.constant dense<0.000000e+00> : vector<8x8xf32>
    %134 = tpu.matmul %133, %85, %cst_114 {dimension_numbers = #tpu.dot_dimension_numbers<[1], [0], [0], [1], [0, 0, 1, 1], [], []>} : vector<8x8xf32>, vector<8x8xf32>, vector<8x8xf32> -> vector<8x8xf32>
    %c3_115 = arith.constant 3 : index
    %c0_116 = arith.constant 0 : index
    %c0_117 = arith.constant 0 : index
    %135 = vector.load %arg6[%c3_115, %c0_116, %c0_117] : memref<4x8x32xf32, #tpu.memory_space<vmem>>, vector<1x8x32xf32>
    %136 = vector.shape_cast %135 : vector<1x8x32xf32> to vector<8x32xf32>
    %cst_118 = arith.constant dense<0.000000e+00> : vector<8x32xf32>
    %137 = tpu.matmul %134, %136, %cst_118 {dimension_numbers = #tpu.dot_dimension_numbers<[1], [0], [0], [1], [0, 0, 1, 1], [], []>} : vector<8x8xf32>, vector<8x32xf32>, vector<8x32xf32> -> vector<8x32xf32>
    %138 = arith.addf %132, %137 : vector<8x32xf32>
    %139 = vector.broadcast %115 : vector<1x32xf32> to vector<8x32xf32>
    %140 = arith.addf %138, %139 : vector<8x32xf32>
    %141 = vector.shape_cast %140 : vector<8x32xf32> to vector<1x8x32xf32>
    %c0_119 = arith.constant 0 : index
    %c0_120 = arith.constant 0 : index
    %c0_121 = arith.constant 0 : index
    %142 = vector.load %arg11[%c0_119, %c0_120, %c0_121] : memref<1x8x32xf32, #tpu.memory_space<vmem>>, vector<1x8x32xf32>
    tpu.vector_store %arg11[%c0_119, %c0_120, %c0_121], %141 {strides = array<i32>} : memref<1x8x32xf32, #tpu.memory_space<vmem>>, vector<1x8x32xf32>,
    return
  }
  func.func @transform_0(%arg0: i32) -> (i32, i32) {
    %c0_i32 = arith.constant 0 : i32
    %c0_i32_0 = arith.constant 0 : i32
    return %arg0, %c0_i32 : i32, i32
  }
  func.func @transform_1(%arg0: i32) -> (i32, i32) {
    %c0_i32 = arith.constant 0 : i32
    %c0_i32_0 = arith.constant 0 : i32
    return %arg0, %c0_i32 : i32, i32
  }
  func.func @transform_2(%arg0: i32) -> (i32, i32, i32) {
    %c0_i32 = arith.constant 0 : i32
    %c0_i32_0 = arith.constant 0 : i32
    %c0_i32_1 = arith.constant 0 : i32
    %c0_i32_2 = arith.constant 0 : i32
    return %c0_i32, %c0_i32_0, %c0_i32_1 : i32, i32, i32
  }
  func.func @transform_3(%arg0: i32) -> (i32, i32, i32) {
    %c0_i32 = arith.constant 0 : i32
    %c0_i32_0 = arith.constant 0 : i32
    %c0_i32_1 = arith.constant 0 : i32
    %c0_i32_2 = arith.constant 0 : i32
    return %c0_i32, %c0_i32_0, %c0_i32_1 : i32, i32, i32
  }
  func.func @transform_4(%arg0: i32) -> (i32, i32, i32) {
    %c0_i32 = arith.constant 0 : i32
    %c0_i32_0 = arith.constant 0 : i32
    %c0_i32_1 = arith.constant 0 : i32
    %c0_i32_2 = arith.constant 0 : i32
    return %c0_i32, %c0_i32_0, %c0_i32_1 : i32, i32, i32
  }
  func.func @transform_5(%arg0: i32) -> (i32, i32, i32) {
    %c0_i32 = arith.constant 0 : i32
    %c0_i32_0 = arith.constant 0 : i32
    %c0_i32_1 = arith.constant 0 : i32
    %c0_i32_2 = arith.constant 0 : i32
    return %c0_i32, %c0_i32_0, %c0_i32_1 : i32, i32, i32
  }
  func.func @transform_6(%arg0: i32) -> (i32, i32, i32) {
    %c0_i32 = arith.constant 0 : i32
    %c0_i32_0 = arith.constant 0 : i32
    %c0_i32_1 = arith.constant 0 : i32
    %c0_i32_2 = arith.constant 0 : i32
    return %c0_i32, %c0_i32_0, %c0_i32_1 : i32, i32, i32
  }
  func.func @transform_7(%arg0: i32) -> (i32, i32, i32) {
    %c0_i32 = arith.constant 0 : i32
    %c0_i32_0 = arith.constant 0 : i32
    %c0_i32_1 = arith.constant 0 : i32
    %c0_i32_2 = arith.constant 0 : i32
    return %c0_i32, %c0_i32_0, %c0_i32_1 : i32, i32, i32
  }
  func.func @transform_8(%arg0: i32) -> (i32, i32, i32) {
    %c0_i32 = arith.constant 0 : i32
    %c0_i32_0 = arith.constant 0 : i32
    %c0_i32_1 = arith.constant 0 : i32
    %c0_i32_2 = arith.constant 0 : i32
    return %c0_i32, %c0_i32_0, %c0_i32_1 : i32, i32, i32
  }
  func.func @transform_9(%arg0: i32) -> (i32, i32) {
    %c0_i32 = arith.constant 0 : i32
    %c0_i32_0 = arith.constant 0 : i32
    %c0_i32_1 = arith.constant 0 : i32
    return %c0_i32, %c0_i32_0 : i32, i32
  }
  func.func @transform_10(%arg0: i32) -> (i32, i32, i32) {
    %c0_i32 = arith.constant 0 : i32
    %c0_i32_0 = arith.constant 0 : i32
    %c0_i32_1 = arith.constant 0 : i32
    return %arg0, %c0_i32, %c0_i32_0 : i32, i32, i32
  }
  func.func @transform_11(%arg0: i32) -> (i32, i32, i32, i32) {
    %c0_i32 = arith.constant 0 : i32
    %c0_i32_0 = arith.constant 0 : i32
    %c0_i32_1 = arith.constant 0 : i32
    %c0_i32_2 = arith.constant 0 : i32
    return %arg0, %c0_i32, %c0_i32_0, %c0_i32_1 : i32, i32, i32, i32
  }
}

</mosaic_0001>

<bundles_post_ra>
// kernel: tpu_custom_call.1
= control target key start
LH: loop header
LB: loop body
LE: loop exit
PB: predicated region body
PF: predicated region fallthrough
CT: control target
= control target key end

     0   :  { %s3677_s0 = inlined_call_operand.vmem [shape: f32[16,32], index: 0, kind: input, shape index: {}]   ;;  %s3678_s1 = inlined_call_operand.vmem [shape: f32[16,32], index: 1, kind: input, shape index: {}]   ;;  %s3679_s2 = inlined_call_operand.vmem [shape: f32[4,32,8], index: 2, kind: input, shape index: {}]   ;;  %s3680_s3 = inlined_call_operand.vmem [shape: f32[4,32,8], index: 3, kind: input, shape index: {}]   ;;  %s3681_s4 = inlined_call_operand.vmem [shape: f32[4,32,8], index: 4, kind: input, shape index: {}]   ;;  %s3682_s5 = inlined_call_operand.vmem [shape: f32[4,8,32], index: 5, kind: input, shape index: {}]   ;;  %s3683_s6 = inlined_call_operand.vmem [shape: f32[4,1,8], index: 6, kind: input, shape index: {}]   ;;  %s3684_s7 = inlined_call_operand.vmem [shape: f32[4,1,8], index: 7, kind: input, shape index: {}]   ;;  %s3685_s8 = inlined_call_operand.vmem [shape: f32[4,1,8], index: 8, kind: input, shape index: {}]   ;;  %s3686_s9 = inlined_call_operand.vmem [shape: f32[1,32], index: 9, kind: input, shape index: {}]   ;;  %s3687_s10 = inlined_call_operand.hbm [shape: f32[2,8,32], index: 10, kind: output, shape index: {0}]   ;;  %s3688_s11 = inlined_call_operand.hbm [shape: f32[2,4,8,8], index: 11, kind: output, shape index: {1}]  }
   0x1   :  { %3690 = sst [smem:[#allocation10_spill]] %s3677_s0 }
   0x2   :  { %3691 = sst [smem:[#allocation11_spill]] %s3678_s1 }
   0x3   :  { %17 = vsyncpa [#allocation3], 0 }
   0x4   :  { %19 = vsyncpa [#allocation3 + $0x1], 0 }
   0x5   :  { %20 = vsyncpa [#allocation5], 0 }
   0x6   :  { %22 = vsyncpa [#allocation5 + $0x1], 0  ;;  %s3187_s17 = smov 0   ;;  %s3189_s18 = smov 0  }
   0x7   :  { %s3191_s19 = smov 0   ;;  %s3193_s20 = smov 0  }
   0x8 LB: > { %3692 = sst [smem:[#allocation8_spill]] %s3114_s19  ;;  %s3208_s21 = sadd.s32 4294967295, %s3118_s20   ;;  %s3118_s20 = sphi %s3193_s20, %s3702_s20   ;;  %s3114_s19 = sphi %s3191_s19, %s3699_s19   ;;  %s3110_s18 = sphi %s3189_s18, %s3701_s18   ;;  %s3106_s17 = sphi %s3187_s17, %s3700_s17  }
   0x9   : > { %s2506_s22 = sadd.s32 4294967294, %s3118_s20   ;;  %s3212_s23 = sadd.s32 1, %s3118_s20  }
   0xa   : > { %s255_s24 = sadd.s32 1, %s3114_s19  ;;  %s252_s25 = ssub.s32 %s3118_s20, %s3212_s23 }
   0xb   : > { %p265_p0 = scmp.ne.s32.totalorder %s3114_s19, %s3110_s18  ;;  %p253_p1 = scmp.eq.s32.totalorder %s252_s25, 0 }
   0xc   : > { %p266_p2 = scmp.eq.s32.totalorder %s3208_s21, 1  ;;  %p271_p3 = scmp.ne.s32.totalorder %s3110_s18, %s3106_s17 }
   0xd   : > { %p272_p4 = scmp.eq.s32.totalorder %s2506_s22, 1  ;;  %p2509_p7 = scmp.ge.s32.totalorder %s3118_s20, 1 }
   0xe   : > { %s3223_s26 = scalar_select %p253_p1, %s3114_s19, %s255_s24  }
   0xf   : > { %p3225_p5 = por %p266_p2, %p265_p0  ;;  %p3229_p6 = por %p272_p4, %p271_p3 }
  0x10   : > { %3693 = sst [smem:[#allocation9_spill]] %s3223_s26  ;;  %p354_p8 = scmp.lt.s32.totalorder %s3118_s20, 3 }
  0x12   : > { %p355_p9 = pnand %p2509_p7, %p354_p8 }
  0x13   : > { %v412_v0 = vld [vmem:[%s3679_s2] sm:$0xff] (!%p355_p9)  ;;  %v413_v1 = vld [vmem:[%s3679_s2 + $0x8] sm:$0xff] (!%p355_p9)  ;;  %v3120_v3 = vmov (!%p355_p9), 0.0|0.0   ;;  %v414_v6 = vld [vmem:[%s3679_s2 + $0x10] sm:$0xff] (!%p355_p9)  ;;  %p402_p10 = scmp.lt.s32.totalorder (!%p355_p9), %s3208_s21, 1  ;;  %vm3121_vm0 = vmmov (!%p355_p9), 0  }
  0x14   : > { %358 = sbr.rel (%p355_p9) target bundleno = 1456 (0x5b0), region = 60  ;;  %v2516_v2 = vld [vmem:[%s3679_s2 + $0x20] sm:$0xff] (!%p355_p9)  ;;  %2887 = vmatprep.subr.bf16.mxu0 (!%p355_p9), %v3120_v3  ;;  %2893 = vmatprep.subr.bf16.mxu1 (!%p355_p9), %v3120_v3  ;;  %v2888_v4 = vpack.c.bf16 (!%p355_p9), %v413_v1, %v412_v0  ;;  %v2517_v5 = vld [vmem:[%s3679_s2 + $0x28] sm:$0xff] (!%p355_p9)  ;;  %v415_v7 = vld [vmem:[%s3679_s2 + $0x18] sm:$0xff] (!%p355_p9)  ;;  %v3122_v11 = vmov (!%p355_p9), 0.0   ;;  %s3696_s0 = sld [smem:[#allocation10_spill]] (!%p355_p9) }
  0x15   : > { %v2894_v8 = vpack.c.bf16 (!%p355_p9), %v2517_v5, %v2516_v2  ;;  %v2518_v9 = vld [vmem:[%s3679_s2 + $0x30] sm:$0xff] (!%p355_p9)  ;;  %v2519_v10 = vld [vmem:[%s3679_s2 + $0x38] sm:$0xff] (!%p355_p9)  ;;  %2714 = vmatprep.mubr.msk.f32.mxu1 (!%p355_p9), %vm3121_vm0, %v3122_v11  ;;  %2703 = vmatprep.mubr.msk.f32.mxu0 (!%p355_p9), %vm3121_vm0, %v3122_v11  ;;  %v2891_v12 = vpack.c.bf16 (!%p355_p9), %v415_v7, %v414_v6  ;;  %v2523_v14 = vld [vmem:[%s3679_s2 + $0x40] sm:$0xff] (!%p355_p9)  ;;  %vm423_vm1 = vcmask (!%p355_p9), 261120   ;;  %s3697_s1 = sld [smem:[#allocation11_spill]] (!%p355_p9)  ;;  %vm1409_vm2 = vcmask (!%p355_p9), 64512  }
  0x16   : > { %2889 = vmatpush3.bf16.msra.mxu0 (!%p355_p9), %v2888_v4  ;;  %v2897_v13 = vpack.c.bf16 (!%p355_p9), %v2519_v10, %v2518_v9  ;;  %v2524_v15 = vld [vmem:[%s3679_s2 + $0x48] sm:$0xff] (!%p355_p9)  ;;  %v2530_v16 = vld [vmem:[%s3679_s2 + $0x60] sm:$0xff] (!%p355_p9)  ;;  %v2525_v21 = vld [vmem:[%s3679_s2 + $0x50] sm:$0xff] (!%p355_p9)  ;;  %s3534_s12 = sand.u32 (!%p355_p9), 1, %s3110_s18  }
  0x17   : > { %2895 = vmatpush3.bf16.msra.mxu1 (!%p355_p9), %v2894_v8  ;;  %2890 = vmatprep.subr.bf16.mxu0 (!%p355_p9), %v3120_v3  ;;  %v2531_v17 = vld [vmem:[%s3679_s2 + $0x68] sm:$0xff] (!%p355_p9)  ;;  %v2900_v19 = vpack.c.bf16 (!%p355_p9), %v2524_v15, %v2523_v14  ;;  %v2526_v22 = vld [vmem:[%s3679_s2 + $0x58] sm:$0xff] (!%p355_p9)  ;;  %v2532_v23 = vld [vmem:[%s3679_s2 + $0x70] sm:$0xff] (!%p355_p9)  ;;  %s2511_s19 = sshll.u32 (!%p355_p9), %s3534_s12, 5 }
  0x18   : > { %2896 = vmatprep.subr.bf16.mxu1 (!%p355_p9), %v3120_v3  ;;  %v2906_v20 = vpack.c.bf16 (!%p355_p9), %v2531_v17, %v2530_v16  ;;  %v2533_v24 = vld [vmem:[%s3679_s2 + $0x78] sm:$0xff] (!%p355_p9)  ;;  %v2903_v25 = vpack.c.bf16 (!%p355_p9), %v2526_v22, %v2525_v21  ;;  %v746_v27 = vld [vmem:[%s3680_s3] sm:$0xff] (!%p355_p9)  ;;  %v747_v28 = vld [vmem:[%s3680_s3 + $0x8] sm:$0xff] (!%p355_p9)  ;;  %s3538_s26 = scalar_lea.vmem (!%p355_p9), [#allocation4], %s2511_s19  ;;  %s3123_s19 = smov (!%p355_p9), [#allocation4]  }
  0x19   : > { %v2909_v26 = vpack.c.bf16 (!%p355_p9), %v2533_v24, %v2532_v23  ;;  %v2539_v29 = vld [vmem:[%s3680_s3 + $0x20] sm:$0xff] (!%p355_p9)  ;;  %v2540_v30 = vld [vmem:[%s3680_s3 + $0x28] sm:$0xff] (!%p355_p9)  ;;  %v2912_v31 = vpack.c.bf16 (!%p355_p9), %v747_v28, %v746_v27  ;;  %v748_v33 = vld [vmem:[%s3680_s3 + $0x10] sm:$0xff] (!%p355_p9)  ;;  %s3028_s14 = sshll.u32 (!%p355_p9), %s3123_s19, 4  ;;  %s3029_s14 = int_to_ptr.vmem [resolvable:$false] %s3028_s14 }
  0x1a   : > { %2892 = vmatpush3.bf16.msra.mxu0 (!%p355_p9), %v2891_v12  ;;  %v2918_v32 = vpack.c.bf16 (!%p355_p9), %v2540_v30, %v2539_v29  ;;  %v749_v34 = vld [vmem:[%s3680_s3 + $0x18] sm:$0xff] (!%p355_p9)  ;;  %v2541_v35 = vld [vmem:[%s3680_s3 + $0x30] sm:$0xff] (!%p355_p9)  ;;  %v2546_v39 = vld [vmem:[%s3680_s3 + $0x40] sm:$0xff] (!%p355_p9) }
  0x1b   : > { %s3267_s16 = scalar_select %p402_p10, %s3208_s21, 1  ;;  %2898 = vmatpush3.bf16.msra.mxu1 %v2897_v13  ;;  %2899 = vmatprep.subr.bf16.mxu0 %v3120_v3  ;;  %v2542_v36 = vld [vmem:[%s3680_s3 + $0x38] sm:$0xff]  ;;  %v2915_v37 = vpack.c.bf16 %v749_v34, %v748_v33  ;;  %v2547_v40 = vld [vmem:[%s3680_s3 + $0x48] sm:$0xff]  ;;  %v2553_v41 = vld [vmem:[%s3680_s3 + $0x60] sm:$0xff] }
  0x1c   : > { %2905 = vmatprep.subr.bf16.mxu1 %v3120_v3  ;;  %v2921_v38 = vpack.c.bf16 %v2542_v36, %v2541_v35  ;;  %v2554_v42 = vld [vmem:[%s3680_s3 + $0x68] sm:$0xff]  ;;  %v2924_v44 = vpack.c.bf16 %v2547_v40, %v2546_v39  ;;  %v2548_v46 = vld [vmem:[%s3680_s3 + $0x50] sm:$0xff]  ;;  %v2549_v47 = vld [vmem:[%s3680_s3 + $0x58] sm:$0xff] }
  0x1d   : > { %s2512_s30 = sshll.u32 %s3267_s16, 3  ;;  %v2930_v45 = vpack.c.bf16 %v2554_v42, %v2553_v41  ;;  %v2555_v48 = vld [vmem:[%s3680_s3 + $0x70] sm:$0xff]  ;;  %v2556_v49 = vld [vmem:[%s3680_s3 + $0x78] sm:$0xff]  ;;  %v2927_v50 = vpack.c.bf16 %v2549_v47, %v2548_v46  ;;  %v1079_v52 = vld [vmem:[%s3681_s4] sm:$0xff] }
  0x1e   : > { %s405_s22 = scalar_lea.vmem %s3696_s0, %s2512_s30  ;;  %s409_s13 = scalar_lea.vmem %s3697_s1, %s2512_s30  ;;  %v2933_v51 = vpack.c.bf16 %v2556_v49, %v2555_v48  ;;  %v1080_v53 = vld [vmem:[%s3681_s4 + $0x8] sm:$0xff]  ;;  %v2562_v54 = vld [vmem:[%s3681_s4 + $0x20] sm:$0xff]  ;;  %v1081_v58 = vld [vmem:[%s3681_s4 + $0x10] sm:$0xff] }
  0x1f   : > { %v410_v18 = vld [vmem:[%s405_s22] sm:$0xff]  ;;  %v2563_v55 = vld [vmem:[%s3681_s4 + $0x28] sm:$0xff]  ;;  %v2936_v56 = vpack.c.bf16 %v1080_v53, %v1079_v52  ;;  %v1082_v59 = vld [vmem:[%s3681_s4 + $0x18] sm:$0xff]  ;;  %s2400_s22 = sshll.u32 %s3538_s26, 4  ;;  %s2374_s30 = scalar_lea.sflag [#allocation5], %s3534_s12  ;;  %s3594_s22 = int_to_ptr.vmem [resolvable:$true] %s2400_s22 }
  0x20   : > { %2704 = vmatmul.mubr.msk.f32.vlgmr.msra.gmra.mrb[0].mxu0 %vm423_vm1, %v410_v18  ;;  %2715 = vmatmul.mubr.msk.f32.vlgmr.msra.gmra.mrb[0].mxu1 %vm423_vm1, %v410_v18  ;;  %v3362_v43 = vld [vmem:[%s409_s13] sm:$0xff]  ;;  %v2942_v57 = vpack.c.bf16 %v2563_v55, %v2562_v54  ;;  %v2564_v60 = vld [vmem:[%s3681_s4 + $0x30] sm:$0xff]  ;;  %v2939_v61 = vpack.c.bf16 %v1082_v59, %v1081_v58  ;;  %v2565_v62 = vld [vmem:[%s3681_s4 + $0x38] sm:$0xff]  ;;  %s2610_s13 = sshll.u32 %s3208_s21, 9  ;;  %s3024_s29 = scalar_lea.vmem %s3594_s22, 512 }
  0x21   : > { %2901 = vmatpush3.bf16.msra.mxu0 %v2900_v19  ;;  %2907 = vmatpush3.bf16.msra.mxu1 %v2906_v20  ;;  %v2945_v63 = vpack.c.bf16 %v2565_v62, %v2564_v60  ;;  %v2569_v0 = vld [vmem:[%s3681_s4 + $0x40] sm:$0xff]  ;;  %v2570_v1 = vld [vmem:[%s3681_s4 + $0x48] sm:$0xff]  ;;  %v2571_v7 = vld [vmem:[%s3681_s4 + $0x50] sm:$0xff]  ;;  %s3599_s25 = scalar_lea.hbm %s3688_s11, %s2610_s13  ;;  %p3025_p11 = scmp.ne.s32.totalorder %s3594_s22, %s3024_s29 }
  0x22   : > { %2902 = vmatprep.subr.bf16.mxu0 %v3120_v3  ;;  %2908 = vmatprep.subr.bf16.mxu1 %v3120_v3  ;;  %v2576_v2 = vld [vmem:[%s3681_s4 + $0x60] sm:$0xff]  ;;  %v2948_v4 = vpack.c.bf16 %v2570_v1, %v2569_v0  ;;  %v2577_v5 = vld [vmem:[%s3681_s4 + $0x68] sm:$0xff]  ;;  %v2572_v8 = vld [vmem:[%s3681_s4 + $0x58] sm:$0xff]  ;;  %p3031_p0 = scmp.lt.s32.totalorder %s3594_s22, %s3029_s14 }
  0x23   : > { %2736 = vmatprep.mubr.msk.f32.mxu1 %vm3121_vm0, %v3122_v11  ;;  %2725 = vmatprep.mubr.msk.f32.mxu0 %vm3121_vm0, %v3122_v11  ;;  %v2954_v6 = vpack.c.bf16 %v2577_v5, %v2576_v2  ;;  %v2578_v9 = vld [vmem:[%s3681_s4 + $0x70] sm:$0xff]  ;;  %v2951_v10 = vpack.c.bf16 %v2572_v8, %v2571_v7  ;;  %v2579_v12 = vld [vmem:[%s3681_s4 + $0x78] sm:$0xff]  ;;  %v2537_v21 = vld [vmem:[%s3684_s7] ss:$0 sm:$0xff]  ;;  %p3026_p12 = pnand %p3025_p11, %p3225_p5 }
  0x24   : > { %v2957_v13 = vpack.c.bf16 %v2579_v12, %v2578_v9  ;;  %v2514_v22 = vld [vmem:[%s3683_s6] ss:$0 sm:$0xff]  ;;  %v2544_v23 = vld [vmem:[%s3684_s7 + $0x1] ss:$0 sm:$0xff]  ;;  %v2551_v33 = vld [vmem:[%s3684_s7 + $0x2] ss:$0 sm:$0xff] }
  0x25   : > { %2904 = vmatpush3.bf16.msra.mxu0 %v2903_v25  ;;  %2910 = vmatpush3.bf16.msra.mxu1 %v2909_v26  ;;  %v2521_v28 = vld [vmem:[%s3683_s6 + $0x1] ss:$0 sm:$0xff]  ;;  %v2528_v34 = vld [vmem:[%s3683_s6 + $0x2] ss:$0 sm:$0xff]  ;;  %v2558_v35 = vld [vmem:[%s3684_s7 + $0x3] ss:$0 sm:$0xff]  ;;  %p3027_p13 = pneg %p3026_p12 }
  0x26   : > { %2911 = vmatprep.subr.bf16.mxu0 %v3120_v3  ;;  %2917 = vmatprep.subr.bf16.mxu1 %v3120_v3  ;;  %v2535_v40 = vld [vmem:[%s3683_s6 + $0x3] ss:$0 sm:$0xff]  ;;  %v2567_v46 = vld [vmem:[%s3685_s8 + $0x1] ss:$0 sm:$0xff] }
  0x28   : > { %2726 = vmatmul.mubr.msk.f32.vlgmr.msra.gmra.mrb[2].mxu0 %vm423_vm1, %v410_v18  ;;  %2737 = vmatmul.mubr.msk.f32.vlgmr.msra.gmra.mrb[2].mxu1 %vm423_vm1, %v410_v18 }
  0x29   : > { %2913 = vmatpush3.bf16.msra.mxu0 %v2912_v31  ;;  %2919 = vmatpush3.bf16.msra.mxu1 %v2918_v32 }
  0x2a   : > { %2914 = vmatprep.subr.bf16.mxu0 %v3120_v3  ;;  %2920 = vmatprep.subr.bf16.mxu1 %v3120_v3 }
  0x2b   : > { %2747 = vmatprep.mubr.msk.f32.mxu0 %vm3121_vm0, %v3122_v11  ;;  %2758 = vmatprep.mubr.msk.f32.mxu1 %vm3121_vm0, %v3122_v11 }
  0x2d   : > { %2916 = vmatpush3.bf16.msra.mxu0 %v2915_v37  ;;  %2922 = vmatpush3.bf16.msra.mxu1 %v2921_v38 }
  0x2e   : > { %2923 = vmatprep.subr.bf16.mxu0 %v3120_v3  ;;  %2929 = vmatprep.subr.bf16.mxu1 %v3120_v3 }
  0x30   : > { %2748 = vmatmul.mubr.msk.f32.vlgmr.msra.gmra.mrb[4].mxu0 %vm423_vm1, %v3362_v43  ;;  %2759 = vmatmul.mubr.msk.f32.vlgmr.msra.gmra.mrb[4].mxu1 %vm423_vm1, %v3362_v43 }
  0x31   : > { %2925 = vmatpush3.bf16.msra.mxu0 %v2924_v44  ;;  %2931 = vmatpush3.bf16.msra.mxu1 %v2930_v45  ;;  %v2560_v45 = vld [vmem:[%s3685_s8] ss:$0 sm:$0xff] }
  0x32   : > { %2926 = vmatprep.subr.bf16.mxu0 %v3120_v3  ;;  %2932 = vmatprep.subr.bf16.mxu1 %v3120_v3 }
  0x33   : > { %2769 = vmatprep.mubr.msk.f32.mxu0 %vm3121_vm0, %v3122_v11  ;;  %2780 = vmatprep.mubr.msk.f32.mxu1 %vm3121_vm0, %v3122_v11 }
  0x35   : > { %2928 = vmatpush3.bf16.msra.mxu0 %v2927_v50  ;;  %2934 = vmatpush3.bf16.msra.mxu1 %v2933_v51 }
  0x36   : > { %2935 = vmatprep.subr.bf16.mxu0 %v3120_v3  ;;  %2941 = vmatprep.subr.bf16.mxu1 %v3120_v3 }
  0x38   : > { %2770 = vmatmul.mubr.msk.f32.vlgmr.msra.gmra.mrb[6].mxu0 %vm423_vm1, %v3362_v43  ;;  %2781 = vmatmul.mubr.msk.f32.vlgmr.msra.gmra.mrb[6].mxu1 %vm423_vm1, %v3362_v43 }
  0x39   : > { %2937 = vmatpush3.bf16.msra.mxu0 %v2936_v56  ;;  %2943 = vmatpush3.bf16.msra.mxu1 %v2942_v57 }
  0x3a   : > { %2938 = vmatprep.subr.bf16.mxu0 %v3120_v3  ;;  %2944 = vmatprep.subr.bf16.mxu1 %v3120_v3 }
  0x3b   : > { %2802 = vmatprep.mubr.msk.f32.mxu1 %vm3121_vm0, %v3122_v11  ;;  %2791 = vmatprep.mubr.msk.f32.mxu0 %vm3121_vm0, %v3122_v11 }
  0x3d   : > { %2940 = vmatpush3.bf16.msra.mxu0 %v2939_v61  ;;  %2946 = vmatpush3.bf16.msra.mxu1 %v2945_v63 }
  0x3e   : > { %2947 = vmatprep.subr.bf16.mxu0 %v3120_v3  ;;  %2953 = vmatprep.subr.bf16.mxu1 %v3120_v3 }
  0x40   : > { %2792 = vmatmul.mubr.msk.f32.vlgmr.msra.gmra.mrb[8].mxu0 %vm423_vm1, %v3362_v43  ;;  %2803 = vmatmul.mubr.msk.f32.vlgmr.msra.gmra.mrb[8].mxu1 %vm423_vm1, %v3362_v43 }
  0x41   : > { %2949 = vmatpush3.bf16.msra.mxu0 %v2948_v4  ;;  %2955 = vmatpush3.bf16.msra.mxu1 %v2954_v6 }
  0x42   : > { %2950 = vmatprep.subr.bf16.mxu0 %v3120_v3  ;;  %2956 = vmatprep.subr.bf16.mxu1 %v3120_v3 }
  0x43   : > { %2813 = vmatprep.mubr.msk.f32.mxu0 %vm3121_vm0, %v3122_v11  ;;  %2824 = vmatprep.mubr.msk.f32.mxu1 %vm3121_vm0, %v3122_v11 }
  0x45   : > { %2952 = vmatpush3.bf16.msra.mxu0 %v2951_v10  ;;  %2958 = vmatpush3.bf16.msra.mxu1 %v2957_v13 }
  0x46   : > { %2827 = vmatprep.subr.mxu0 %v3122_v11  ;;  %2832 = vmatprep.subr.mxu1 %v3122_v11 }
  0x48   : > { %2814 = vmatmul.mubr.msk.f32.vlgmr.msra.gmra.mrb[10].mxu0 %vm423_vm1, %v3362_v43  ;;  %2825 = vmatmul.mubr.msk.f32.vlgmr.msra.gmra.mrb[10].mxu1 %vm423_vm1, %v3362_v43 }
  0x49   : > { %2829 = vmatprep.mubr.msk.f32.mxu0 %vm3121_vm0, %v3122_v11  ;;  %2834 = vmatprep.mubr.msk.f32.mxu1 %vm3121_vm0, %v3122_v11 }
  0xf3   : > { %v493_v3 = vpop.f32.mrb[0].mxu0  ;;  %v576_v14 = vpop.f32.mrb[0].mxu1 }
  0xf4   : > { %v2705_v15 = vpop.f32.mrb[1].mxu0  ;;  %v2716_v16 = vpop.f32.mrb[1].mxu1  ;;  %v494_v29 = vadd.f32 %v2514_v22, %v493_v3  ;;  %v577_v32 = vadd.f32 %v2521_v28, %v576_v14 }
  0xfb   : > { %v659_v17 = vpop.f32.mrb[2].mxu0  ;;  %v742_v18 = vpop.f32.mrb[2].mxu1 }
  0xfc   : > { %v2727_v19 = vpop.f32.mrb[3].mxu0  ;;  %v2738_v20 = vpop.f32.mrb[3].mxu1  ;;  %v660_v41 = vadd.f32 %v2528_v34, %v659_v17  ;;  %v743_v44 = vadd.f32 %v2535_v40, %v742_v18  ;;  %v1840_v40 = vld [vmem:[%s3682_s5] sm:$0xff] }
 0x103   : > { %v826_v24 = vpop.f32.mrb[4].mxu0  ;;  %v909_v26 = vpop.f32.mrb[4].mxu1 }
 0x104   : > { %v827_v25 = vadd.f32 %v2537_v21, %v826_v24  ;;  %v2749_v27 = vpop.f32.mrb[5].mxu0  ;;  %v910_v30 = vadd.f32 %v2544_v23, %v909_v26  ;;  %v2760_v31 = vpop.f32.mrb[5].mxu1 }
 0x106   : > { %2828 = vmatpush3.xpose.msk.msra.mxu0 %vm1409_vm2, %v827_v25  ;;  %2833 = vmatpush3.xpose.msk.msra.mxu1 %vm1409_vm2, %v910_v30 }
 0x107   : > { %2837 = vmatprep.subr.mxu0 %v3122_v11  ;;  %2842 = vmatprep.subr.mxu1 %v3122_v11 }
 0x109   : > { %2830 = vmatmul.mubr.msk.f32.vlgmr.msra.gmra.mrb[12].mxu0 %vm1409_vm2, %v494_v29  ;;  %2835 = vmatmul.mubr.msk.f32.vlgmr.msra.gmra.mrb[12].mxu1 %vm1409_vm2, %v577_v32 }
 0x10a   : > { %2839 = vmatprep.mubr.msk.f32.mxu0 %vm3121_vm0, %v3122_v11  ;;  %2844 = vmatprep.mubr.msk.f32.mxu1 %vm3121_vm0, %v3122_v11 }
 0x10b   : > { %v992_v36 = vpop.f32.mrb[6].mxu0  ;;  %v1075_v38 = vpop.f32.mrb[6].mxu1 }
 0x10c   : > { %v993_v37 = vadd.f32 %v2551_v33, %v992_v36  ;;  %v2771_v39 = vpop.f32.mrb[7].mxu0  ;;  %v1076_v42 = vadd.f32 %v2558_v35, %v1075_v38  ;;  %v2782_v43 = vpop.f32.mrb[7].mxu1 }
 0x10d   : > { %v2593_v39 = vld [vmem:[%s3682_s5 + $0x8] sm:$0xff] }
 0x10e   : > { %2838 = vmatpush3.xpose.msk.msra.mxu0 %vm1409_vm2, %v993_v37  ;;  %2843 = vmatpush3.xpose.msk.msra.mxu1 %vm1409_vm2, %v1076_v42 }
 0x10f   : > { %2847 = vmatprep.subr.mxu0 %v3122_v11  ;;  %2852 = vmatprep.subr.mxu1 %v3122_v11 }
 0x111   : > { %2840 = vmatmul.mubr.msk.f32.vlgmr.msra.gmra.mrb[14].mxu0 %vm1409_vm2, %v660_v41  ;;  %2845 = vmatmul.mubr.msk.f32.vlgmr.msra.gmra.mrb[14].mxu1 %vm1409_vm2, %v743_v44  ;;  %v2574_v44 = vld [vmem:[%s3685_s8 + $0x2] ss:$0 sm:$0xff] }
 0x112   : > { %2849 = vmatprep.mubr.msk.f32.mxu0 %vm3121_vm0, %v3122_v11  ;;  %2854 = vmatprep.mubr.msk.f32.mxu1 %vm3121_vm0, %v3122_v11 }
 0x113   : > { %v1156_v47 = vpop.f32.mrb[8].mxu0  ;;  %v1239_v48 = vpop.f32.mrb[8].mxu1 }
 0x114   : > { %v1157_v49 = vadd.f32 %v2560_v45, %v1156_v47  ;;  %v2793_v50 = vpop.f32.mrb[9].mxu0  ;;  %v1240_v51 = vadd.f32 %v2567_v46, %v1239_v48  ;;  %v2804_v52 = vpop.f32.mrb[9].mxu1 }
 0x115   : > { %v2597_v52 = vld [vmem:[%s3682_s5 + $0x10] sm:$0xff] }
 0x116   : > { %2848 = vmatpush3.msra.mxu0 %v1157_v49  ;;  %2853 = vmatpush3.msra.mxu1 %v1240_v51  ;;  %v2581_v49 = vld [vmem:[%s3685_s8 + $0x3] ss:$0 sm:$0xff] }
 0x117   : > { %2857 = vmatprep.subr.mxu0 %v3122_v11  ;;  %2862 = vmatprep.subr.mxu1 %v3122_v11 }
 0x11b   : > { %v3522_v53 = vpop.f32.mrb[10].mxu0  ;;  %v3524_v54 = vpop.f32.mrb[10].mxu1 }
 0x11c   : > { %v2815_v55 = vpop.f32.mrb[11].mxu0  ;;  %v2826_v56 = vpop.f32.mrb[11].mxu1  ;;  %v1323_v46 = vadd.f32 %v2574_v44, %v3522_v53  ;;  %v1406_v51 = vadd.f32 %v2581_v49, %v3524_v54 }
 0x1dc   : > { %v1482_v57 = vpop.f32.mrb[12].mxu0  ;;  %v1559_v59 = vpop.f32.mrb[12].mxu1 }
 0x1dd   : > { %v1486_v58 = vmul.f32 0.35355338, %v1482_v57  ;;  %v2831_v60 = vpop.f32.mrb[13].mxu0  ;;  %v1563_v61 = vmul.f32 0.35355338, %v1559_v59  ;;  %v2836_v62 = vpop.f32.mrb[13].mxu1 }
 0x1df   : > { %v1718_v63 = vsel %vm1409_vm2, %v1486_v58, -inf  ;;  %v1721_v0 = vsel %vm1409_vm2, %v1563_v61, -inf }
 0x1e0   : > { %1719 = vmax.xlane.f32.xlu1 %v1718_v63  ;;  %1722 = vmax.xlane.f32.xlu0 %v1721_v0 }
 0x1e4   : > { %v1636_v1 = vpop.f32.mrb[14].mxu0  ;;  %v1713_v4 = vpop.f32.mrb[14].mxu1 }
 0x1e5   : > { %v1640_v2 = vmul.f32 0.35355338, %v1636_v1  ;;  %v2841_v5 = vpop.f32.mrb[15].mxu0  ;;  %v2846_v6 = vpop.f32.mrb[15].mxu1  ;;  %v1717_v20 = vmul.f32 0.35355338, %v1713_v4 }
 0x1e7   : > { %v1724_v7 = vsel %vm1409_vm2, %v1640_v2, -inf  ;;  %v1727_v22 = vsel %vm1409_vm2, %v1717_v20, -inf }
 0x1e8   : > { %1725 = vmax.xlane.f32.xlu1 %v1724_v7 }
 0x26d   : > { %v1720_v8 = vpop.xlane.xlu1 %1719  ;;  %v1723_v9 = vpop.xlane.xlu0 %1722 }
 0x26e   : > { %v1730_v10 = vsub.f32 %v1486_v58, %v1720_v8  ;;  %v1731_v12 = vsub.f32 %v1563_v61, %v1723_v9  ;;  %v2600_v58 = vld [vmem:[%s3682_s5 + $0x18] sm:$0xff] }
 0x270   : > { %v1734_v13 = vmul.f32 1.442695, %v1730_v10  ;;  %v1736_v3 = vmul.f32 1.442695, %v1731_v12 }
 0x272   : > { %3008 = vpow2.f32 %v1734_v13 }
 0x273   : > { %3010 = vpow2.f32 %v1736_v3 }
 0x275   : > { %v1726_v14 = vpop.xlane.xlu1 %1725 }
 0x276   : > { %v1732_v15 = vsub.f32 %v1640_v2, %v1726_v14 }
 0x278   : > { %v1738_v16 = vmul.f32 1.442695, %v1732_v15 }
 0x27a   : > { %3012 = vpow2.f32 %v1738_v16 }
 0x27c   : > { %v3009_v17 = vpop.eup %3008 }
 0x27d   : > { %v3011_v18 = vpop.eup %3010  ;;  %v1742_v19 = vsel %vm1409_vm2, %v3009_v17, 0.0 }
 0x27e   : > { %v1745_v21 = vsel %vm1409_vm2, %v3011_v18, 0.0  ;;  %1743 = vadd.xlane.f32.xlu1 %v1742_v19 }
 0x27f   : > { %1746 = vadd.xlane.f32.xlu0 %v1745_v21 }
 0x283   : > { %1728 = vmax.xlane.f32.xlu0 %v1727_v22 }
 0x284   : > { %v3013_v23 = vpop.eup %3012 }
 0x285   : > { %v1748_v24 = vsel %vm1409_vm2, %v3013_v23, 0.0 }
 0x287   : > { %1749 = vadd.xlane.f32.xlu0 %v1748_v24 }
 0x30b   : > { %v1744_v25 = vpop.xlane.xlu1 %1743 }
 0x30c   : > { %v1747_v26 = vpop.xlane.xlu0 %1746  ;;  %3014 = vrcp.f32 %v1744_v25 }
 0x30d   : > { %3016 = vrcp.f32 %v1747_v26 }
 0x310   : > { %v1729_v27 = vpop.xlane.xlu0 %1728 }
 0x311   : > { %v1733_v28 = vsub.f32 %v1717_v20, %v1729_v27 }
 0x313   : > { %v1740_v29 = vmul.f32 1.442695, %v1733_v28 }
 0x314   : > { %v1750_v30 = vpop.xlane.xlu0 %1749 }
 0x315   : > { %3018 = vpow2.f32 %v1740_v29 }
 0x316   : > { %v3015_v31 = vpop.eup %3014  ;;  %3020 = vrcp.f32 %v1750_v30 }
 0x317   : > { %v3017_v32 = vpop.eup %3016  ;;  %v1758_v33 = vmul.f32 %v3015_v31, %v3009_v17 }
 0x318   : > { %v1759_v34 = vmul.f32 %v3017_v32, %v3011_v18 }
 0x319   : > { %2850 = vmatmul.mubr.msk.f32.vlgmr.msra.gmra.mrb[16].mxu0 %vm1409_vm2, %v1758_v33  ;;  %1762 = vst.msk [vmem:[%s3538_s26] sm:$0xff] %vm1409_vm2, %v1758_v33 }
 0x31a   : > { %2855 = vmatmul.mubr.msk.f32.vlgmr.msra.gmra.mrb[16].mxu1 %vm1409_vm2, %v1759_v34  ;;  %2859 = vmatprep.mubr.msk.f32.mxu0 %vm3121_vm0, %v3122_v11  ;;  %1763 = vst.msk [vmem:[%s3538_s26 + $0x8] sm:$0xff] %vm1409_vm2, %v1759_v34 }
 0x31b   : > { %2864 = vmatprep.mubr.msk.f32.mxu1 %vm3121_vm0, %v3122_v11  ;;  %2858 = vmatpush3.msra.mxu0 %v2593_v39 }
 0x31c   : > { %2867 = vmatprep.subr.mxu0 %v3122_v11  ;;  %2863 = vmatpush3.msra.mxu1 %v1840_v40 }
 0x31d   : > { %2872 = vmatprep.subr.mxu1 %v3122_v11 }
 0x31f   : > { %v3019_v35 = vpop.eup %3018 }
 0x320   : > { %v3021_v36 = vpop.eup %3020  ;;  %v1751_v37 = vsel %vm1409_vm2, %v3019_v35, 0.0 }
 0x321   : > { %v1760_v38 = vmul.f32 %v3021_v36, %v3013_v23  ;;  %1752 = vadd.xlane.f32.xlu1 %v1751_v37 }
 0x323   : > { %1764 = vst.msk [vmem:[%s3538_s26 + $0x10] sm:$0xff] %vm1409_vm2, %v1760_v38 }
 0x3ae   : > { %v1753_v41 = vpop.xlane.xlu1 %1752 }
 0x3af   : > { %3022 = vrcp.f32 %v1753_v41 }
 0x3b9   : > { %v3023_v42 = vpop.eup %3022 }
 0x3ba   : > { %v1761_v43 = vmul.f32 %v3023_v42, %v3019_v35 }
 0x3bc   : > { %1765 = vst.msk [vmem:[%s3538_s26 + $0x18] sm:$0xff] %vm1409_vm2, %v1761_v43  ;;  %s3030_s26 = scalar_lea.vmem %s3029_s14, 1024 }
 0x3bd   : > { %p3032_p1 = scmp.lt.s32.totalorder %s3030_s26, %s3024_s29 }
 0x3bf   : > { %p3033_p2 = por %p3032_p1, %p3031_p0 }
 0x3c1   : > { %p3034_p3 = pnand %p3033_p2, %p3027_p13 }
 0x3ec   : > { %v1836_v45 = vpop.f32.mrb[16].mxu0 }
 0x3ed   : > { %v1910_v47 = vpop.f32.mrb[16].mxu1  ;;  %v2851_v48 = vpop.f32.mrb[17].mxu0  ;;  %2865 = vmatmul.mubr.msk.f32.vlgmr.msra.gmra.mrb[18].mxu1 %vm1409_vm2, %v1836_v45 }
 0x3ee   : > { %v2856_v50 = vpop.f32.mrb[17].mxu1  ;;  %2860 = vmatmul.mubr.msk.f32.vlgmr.msra.gmra.mrb[18].mxu0 %vm1409_vm2, %v1910_v47  ;;  %2874 = vmatprep.mubr.msk.f32.mxu1 %vm3121_vm0, %v3122_v11 }
 0x3ef   : > { %2868 = vmatpush3.msra.mxu0 %v1323_v46  ;;  %2869 = vmatprep.mubr.msk.f32.mxu0 %vm3121_vm0, %v3122_v11 }
 0x3f0   : > { %2877 = vmatprep.subr.mxu0 %v3122_v11  ;;  %2873 = vmatpush3.msra.mxu1 %v2597_v52 }
 0x3f1   : > { %2882 = vmatprep.subr.mxu1 %v3122_v11 }
 0x3f2   : > { %2870 = vmatmul.mubr.msk.f32.vlgmr.msra.gmra.mrb[20].mxu0 %vm1409_vm2, %v1760_v38 }
 0x3f3   : > { %2878 = vmatpush3.msra.mxu0 %v1406_v51  ;;  %2879 = vmatprep.mubr.msk.f32.mxu0 %vm3121_vm0, %v3122_v11 }
 0x3f6   : > { %2880 = vmatmul.mubr.msk.f32.vlgmr.msra.gmra.mrb[22].mxu0 %vm1409_vm2, %v1761_v43 }
 0x4c0   : > { %v2058_v53 = vpop.f32.mrb[18].mxu1 }
 0x4c1   : > { %v1985_v55 = vpop.f32.mrb[18].mxu0  ;;  %v2866_v54 = vpop.f32.mrb[19].mxu1 }
 0x4c2   : > { %v2059_v56 = vadd.f32 %v2058_v53, %v1985_v55  ;;  %v2861_v57 = vpop.f32.mrb[19].mxu0 }
 0x4c5   : > { %v2131_v59 = vpop.f32.mrb[20].mxu0 }
 0x4c6   : > { %v2871_v60 = vpop.f32.mrb[21].mxu0  ;;  %2875 = vmatmul.mubr.msk.f32.vlgmr.msra.gmra.mrb[20].mxu1 %vm1409_vm2, %v2131_v59 }
 0x4c7   : > { %2883 = vmatpush3.msra.mxu1 %v2600_v58  ;;  %2884 = vmatprep.mubr.msk.f32.mxu1 %vm3121_vm0, %v3122_v11 }
 0x4c9   : > { %v2280_v61 = vpop.f32.mrb[22].mxu0 }
 0x4ca   : > { %v2881_v62 = vpop.f32.mrb[23].mxu0  ;;  %2885 = vmatmul.mubr.msk.f32.vlgmr.msra.gmra.mrb[22].mxu1 %vm1409_vm2, %v2280_v61 }
 0x4cb   : > { %3037 = shalt.err (!%p3034_p3)
}
 0x4cc   : > { %s3038_s15 = scalar_lea.hbm %s3599_s25, 512  ;;  %s3042_s16 = scalar_lea.hbm %s3688_s11, 1024 }
 0x4cd   : > { %p3039_p4 = scmp.ne.s32.totalorder %s3599_s25, %s3038_s15  ;;  %p3043_p9 = scmp.lt.u32.totalorder %s3599_s25, %s3688_s11 }
 0x4ce   : > { %p3044_p10 = scmp.lt.u32.totalorder %s3042_s16, %s3038_s15  ;;  %p3046_p12 = scmp.lt.u32.totalorder %s3038_s15, %s3599_s25 }
 0x4cf   : > { %p3040_p7 = pnand %p3039_p4, %p3225_p5 }
 0x4d0   : > { %p3045_p11 = por %p3044_p10, %p3043_p9 }
 0x4d1   : > { %p3041_p8 = pneg %p3040_p7 }
 0x4d2   : > { %p3047_p13 = por %p3046_p12, %p3045_p11 }
 0x4d4   : > { %p3048_p0 = pnand %p3047_p13, %p3041_p8 }
 0x4d6   : > { %3051 = shalt.err (!%p3048_p0)
}
 0x4d7   : > { %s3124_s29 = smov 128   ;;  %s3125_s26 = smov 8   ;;  %v2602_v1 = vld [vmem:[%s3686_s9] ss:$0 sm:$0xff] }
 0x4d8   : > { %2960 = dma.vmem_to_hbm [thread:$0]  (%p3225_p5), %s3594_s22, 512, %s3599_s25, %s2374_s30, %s3124_s29, %s3124_s29, %s3125_s26  }
 0x4d9   : > { %s2510_s13 = sshll.u32 %s3534_s12, 3  ;;  %s2605_s16 = sshll.u32 %s3208_s21, 7 }
 0x4da   : > { %s394_s19 = scalar_lea.vmem [#allocation2], %s2510_s13  ;;  %s3633_s22 = scalar_lea.hbm %s3687_s10, %s2605_s16 }
 0x4db   : > { %s2387_s14 = sshll.u32 %s394_s19, 4  ;;  %s2369_s25 = scalar_lea.sflag [#allocation3], %s3534_s12  ;;  %s3635_s14 = int_to_ptr.vmem [resolvable:$true] %s2387_s14 }
 0x4dc   : > { %s3052_s30 = scalar_lea.vmem %s3635_s14, 128  ;;  %s3126_s21 = smov [#allocation2]  }
 0x4dd   : > { %p3053_p1 = scmp.ne.s32.totalorder %s3635_s14, %s3052_s30  ;;  %s3056_s29 = sshll.u32 %s3126_s21, 4  ;;  %s3057_s29 = int_to_ptr.vmem [resolvable:$false] %s3056_s29 }
 0x4de   : > { %s3058_s26 = scalar_lea.vmem %s3057_s29, 256  ;;  %p3059_p4 = scmp.lt.s32.totalorder %s3635_s14, %s3057_s29 }
 0x4df   : > { %p3054_p2 = pnand %p3053_p1, %p3225_p5  ;;  %p3060_p7 = scmp.lt.s32.totalorder %s3058_s26, %s3052_s30 }
 0x4e1   : > { %p3055_p3 = pneg %p3054_p2  ;;  %p3061_p8 = por %p3060_p7, %p3059_p4 }
 0x4e3   : > { %p3062_p9 = pnand %p3061_p8, %p3055_p3 }
 0x599   : > { %v2206_v11 = vpop.f32.mrb[20].mxu1 }
 0x59a   : > { %v2210_v63 = vadd.f32 %v2206_v11, %v2059_v56  ;;  %v2876_v0 = vpop.f32.mrb[21].mxu1 }
 0x59d   : > { %v2355_v2 = vpop.f32.mrb[22].mxu1 }
 0x59e   : > { %v2359_v4 = vadd.f32 %v2355_v2, %v2210_v63  ;;  %v2886_v5 = vpop.f32.mrb[23].mxu1 }
 0x5a0   : > { %v2366_v6 = vadd.f32 %v2602_v1, %v2359_v4 }
 0x5a2   : > { %2367 = vst.msk [vmem:[%s394_s19] sm:$0xff] %vm423_vm1, %v2366_v6 }
 0x5a3   : > { %3065 = shalt.err (!%p3062_p9)
}
 0x5a4   : > { %s3066_s0 = scalar_lea.hbm %s3633_s22, 128  ;;  %s3070_s13 = scalar_lea.hbm %s3687_s10, 256 }
 0x5a5   : > { %p3067_p10 = scmp.ne.s32.totalorder %s3633_s22, %s3066_s0  ;;  %p3071_p13 = scmp.lt.u32.totalorder %s3633_s22, %s3687_s10 }
 0x5a6   : > { %p3072_p0 = scmp.lt.u32.totalorder %s3070_s13, %s3066_s0  ;;  %p3074_p2 = scmp.lt.u32.totalorder %s3066_s0, %s3633_s22 }
 0x5a7   : > { %p3068_p11 = pnand %p3067_p10, %p3225_p5 }
 0x5a8   : > { %p3073_p1 = por %p3072_p0, %p3071_p13 }
 0x5a9   : > { %p3069_p12 = pneg %p3068_p11 }
 0x5aa   : > { %p3075_p3 = por %p3074_p2, %p3073_p1 }
 0x5ac   : > { %p3076_p4 = pnand %p3075_p3, %p3069_p12 }
 0x5ae   : > { %3079 = shalt.err (!%p3076_p4)
}
 0x5af   : > { %2959 = dma.vmem_to_hbm [thread:$0]  (%p3225_p5), %s3635_s14, 128, %s3633_s22, %s2369_s25  }
 0x5b0 PF: > { %p2970_p7 = scmp.ge.s32.totalorder %s3118_s20, 2  ;;  %s2415_s16 = sand.u32 1, %s3106_s17  }
 0x5b1   : > { %s2416_s19 = scalar_lea.sflag [#allocation3], %s2415_s16 }
 0x5b2   : > { %p2964_p8 = pnand %p2970_p7, %p3229_p6 }
 0x5b4   : > { %3097 = dma.done.wait (!%p2964_p8), %s2416_s19, 128  }
 0x5b5   : > { %3099 = vsyncadd (!%p2964_p8), %s2416_s19, 4294967168  ;;  %s2425_s30 = scalar_lea.sflag [#allocation5], %s2415_s16 }
 0x5b6   : > { %3101 = dma.done.wait (!%p2964_p8), %s2425_s30, 512  }
 0x5b7   : > { %3103 = vsyncadd (!%p2964_p8), %s2425_s30, 4294966784  ;;  %s3698_s27 = sld [smem:[#allocation8_spill]]  ;;  %s3699_s19 = sld [smem:[#allocation9_spill]] }
 0x5b8   : > { %p25_p5 = scmp.ge.s32.totalorder %s3212_s23, 4   ;;  %s3700_s17 = smov %s3110_s18 }
 0x5b9   : > { %s3702_s20 = smov %s3212_s23 }
 0x5ba   :  { %27 = sbr.rel (!%p25_p5) target bundleno = 8 (0x8), region = 136 }
 0x5bd   : > { %s3701_s18 = smov %s3698_s27 }
 0x5c1   :  { %2430 = vsyncpa [#allocation3], 1 }
 0x5c2   :  { %2432 = vsyncpa [#allocation3 + $0x1], 1 }
 0x5c3   :  { %2433 = vsyncpa [#allocation5], 1 }
 0x5c4   :  { %2435 = vsyncpa [#allocation5 + $0x1], 1 }

</bundles_post_ra>
